<compile_context>
chip_gen: v5e
topology: v5e:2x2
jax: 0.10.0
libtpu: 0.0.40
codegen_flags: <defaults>
</compile_context>

<pallas_src>
import functools
import math

import jax
import jax.numpy as jnp
import numpy as np
from jax.experimental import pallas as pl
from jax.experimental.pallas import tpu as pltpu


def _round_up(x, m):
    return ((x + m - 1) // m) * m


def _vmem_capacity_bytes():
    """Physical VMEM of the attached TPU; conservative fallback = v7x per-TC (64 MiB)."""
    try:
        info = pltpu.get_tpu_info()
        cap = getattr(info, "vmem_capacity_bytes", None)
        if cap:
            return int(cap)
    except Exception:
        pass
    return 64 * 1024 * 1024


def _auto_tiles(n_dst, n_src, f_edge, vmem_budget_bytes):
    """Largest streamed tiles whose double-buffered working set fits ~60% of the VMEM budget.

    bf16 sublane packing -> dst tile multiple of 16; lane (DMA-contiguous) axis -> src tile
    multiple of 128.  The edge block dominates: tile_nd * tile_ns * F_edge * 2 B * 2 buffers.
    """
    tile_nd = min(256, _round_up(n_dst, 16))
    usable = int(vmem_budget_bytes * 0.6)
    # Per source column, double-buffered bf16: edge block (f_edge cols) + adj block (1 col).
    bytes_per_src_col = 2 * 2 * tile_nd * (f_edge + 1)
    max_ns = max(128, (usable // bytes_per_src_col) // 128 * 128)
    tile_ns = int(min(max_ns, 8192, _round_up(n_src, 128)))
    return tile_nd, tile_ns


def conv_layer_kernel(adj_ref, edge2d_ref, h_neigh_ref, h_self_ref, sel_ref,
                      w_self_t_ref, w_neigh_n_t_ref, w_neigh_e_t_ref,
                      o_ref, acc_neigh_ref, acc_edge_ref, *, deg_col):
    """Grid = (dst tiles [parallel], src tiles [arbitrary reduction])."""
    k = pl.program_id(1)

    @pl.when(k == 0)
    def _init():
        acc_neigh_ref[...] = jnp.zeros_like(acc_neigh_ref)
        acc_edge_ref[...] = jnp.zeros_like(acc_edge_ref)

    # Streaming phase: two bf16 MXU matmuls per step, both accumulating in f32.
    #   adj @ [h_neigh | 1]   -> partial neighbour-feature sums + exact in-degree (ones column).
    #   edge2d @ S            -> per-channel edge-feature partial sums via a resident 0/1
    #                            block-diagonal selector (native (Nd, Ns, Fe) HBM layout, no
    #                            wrapper transpose; reduce runs on the otherwise idle MXU).
    acc_neigh_ref[...] += jnp.dot(adj_ref[...], h_neigh_ref[...],
                                  preferred_element_type=jnp.float32)
    acc_edge_ref[...] += jnp.dot(edge2d_ref[...], sel_ref[...],
                                 preferred_element_type=jnp.float32)

    @pl.when(k == pl.num_programs(1) - 1)
    def _finalize():
        acc = acc_neigh_ref[...]                                  # (Tnd, Fn+1) f32
        deg = acc[:, deg_col:deg_col + 1]                         # exact integer counts (f32 acc)
        inv_deg = jnp.where(deg > 0.0, 1.0 / deg, 0.0)            # DGL mean -> 0 for deg==0

        # Means cast to bf16 so the finalize matmuls are native bf16 MXU ops (f32 accumulation).
        neigh = (acc * inv_deg).astype(jnp.bfloat16)              # deg column hits a zero W row
        edge = (acc_edge_ref[...] * inv_deg).astype(jnp.bfloat16)

        z = jnp.dot(h_self_ref[...], w_self_t_ref[...], preferred_element_type=jnp.float32)
        z += jnp.dot(neigh, w_neigh_n_t_ref[...], preferred_element_type=jnp.float32)
        z += jnp.dot(edge, w_neigh_e_t_ref[...], preferred_element_type=jnp.float32)

        z = jnp.maximum(z, 0.0)                                   # ReLU
        ssq = jnp.sum(z * z, axis=1, keepdims=True)
        inv_norm = jnp.where(ssq > 0.0, jax.lax.rsqrt(ssq), 1.0)  # zero rows divided by 1
        o_ref[...] = (z * inv_norm).astype(o_ref.dtype)


def conv_layer_forward(adj, edge_feats, h_neigh, h_self, w_self, w_neigh,
                       *, tile_nd=None, tile_ns=None, vmem_budget_bytes=None):
    """adj:(Nd,Ns) edge_feats:(Nd,Ns,Fe, pre-masked by adj) h_neigh:(Ns,Fn) h_self:(Nd,Fs)
       w_self:(Fo,Fs) w_neigh:(Fo,Fn+Fe)   (PyTorch nn.Linear weight layout)."""
    n_dst, n_src = adj.shape
    f_edge = edge_feats.shape[2]
    f_neigh = h_neigh.shape[1]
    f_self = h_self.shape[1]
    f_out = w_self.shape[0]

    f_neigh_aug = f_neigh + 1                  # extra ones column -> degree from the same matmul
    f_out_pad = _round_up(f_out, 128)          # lane-dense output slab (unmasked stores)

    # Per-generation VMEM budget: v5e/v6e (128 MiB phys) -> 96 MiB, v7x (64 MiB phys) -> 48 MiB.
    if vmem_budget_bytes is None:
        vmem_budget_bytes = min((_vmem_capacity_bytes() * 3) // 4, 96 * 1024 * 1024)
    auto_nd, auto_ns = _auto_tiles(n_dst, n_src, f_edge, vmem_budget_bytes)
    tile_nd = auto_nd if tile_nd is None else tile_nd
    tile_ns = auto_ns if tile_ns is None else tile_ns

    nd_pad = _round_up(n_dst, tile_nd)
    ns_pad = _round_up(n_src, tile_ns)
    assert tile_nd % 16 == 0, "bf16 packs 2 rows/sublane; dst tile must be a multiple of 16"
    assert tile_ns == ns_pad or tile_ns % 128 == 0

    cdt = jnp.bfloat16                         # streamed operands + weights in bf16 (adj 0/1 exact)

    # --- big streamed operands: avoid extra HBM passes; pad only if tiles don't divide them ---
    adj_c = adj.astype(cdt)
    edge_c = edge_feats.astype(cdt)
    pad_nd, pad_ns = nd_pad - n_dst, ns_pad - n_src
    if pad_nd or pad_ns:
        # TODO(synk): a production producer should hand over already-padded (or tile-divisible)
        # adj/edge_feats so this extra HBM pass over the dominant tensor disappears entirely.
        adj_c = jnp.pad(adj_c, ((0, pad_nd), (0, pad_ns)))
        edge_c = jnp.pad(edge_c, ((0, pad_nd), (0, pad_ns), (0, 0)))
    edge2d = edge_c.reshape(nd_pad, ns_pad * f_edge)               # free row-major reshape

    # --- small operands (cheap to pad / relayout in the wrapper) ---
    hn_aug = jnp.concatenate([h_neigh.astype(cdt), jnp.ones((n_src, 1), cdt)], axis=1)
    if pad_ns:
        hn_aug = jnp.pad(hn_aug, ((0, pad_ns), (0, 0)))
    hs = h_self.astype(cdt)
    if pad_nd:
        hs = jnp.pad(hs, ((0, pad_nd), (0, 0)))

    # Block-diagonal 0/1 selector: row s*Fe+f has a 1 in column f  -> edge2d @ S = per-channel sums.
    sel = jnp.tile(jnp.eye(f_edge, dtype=cdt), (tile_ns, 1))       # (tile_ns*Fe, Fe)

    # Resident weights in bf16; split fc_neigh into neigh / edge halves, pad F_out to 128.
    w_self_t = jnp.zeros((f_self, f_out_pad), cdt).at[:, :f_out].set(
        jnp.transpose(w_self).astype(cdt))
    w_neigh_t = jnp.transpose(w_neigh)                             # (Fn+Fe, Fo)
    w_n_aug = jnp.zeros((f_neigh_aug, f_out_pad), cdt).at[:f_neigh, :f_out].set(
        w_neigh_t[:f_neigh, :].astype(cdt))                        # degree row stays zero
    w_e_pad = jnp.zeros((f_edge, f_out_pad), cdt).at[:, :f_out].set(
        w_neigh_t[f_neigh:, :].astype(cdt))

    grid = (nd_pad // tile_nd, ns_pad // tile_ns)
    kernel = functools.partial(conv_layer_kernel, deg_col=f_neigh)

    out_pad = pl.pallas_call(
        kernel,
        out_shape=jax.ShapeDtypeStruct((nd_pad, f_out_pad), jnp.float32),
        grid_spec=pltpu.PrefetchScalarGridSpec(
            num_scalar_prefetch=0,
            grid=grid,
            in_specs=[
                pl.BlockSpec((tile_nd, tile_ns), lambda i, k: (i, k)),             # adj
                pl.BlockSpec((tile_nd, tile_ns * f_edge), lambda i, k: (i, k)),    # edge (native layout)
                pl.BlockSpec((tile_ns, f_neigh_aug), lambda i, k: (k, 0)),         # [h_neigh | 1]
                pl.BlockSpec((tile_nd, f_self), lambda i, k: (i, 0)),              # h_self
                pl.BlockSpec((tile_ns * f_edge, f_edge), lambda i, k: (0, 0)),     # selector (resident)
                pl.BlockSpec((f_self, f_out_pad), lambda i, k: (0, 0)),            # W_self^T
                pl.BlockSpec((f_neigh_aug, f_out_pad), lambda i, k: (0, 0)),       # W_neigh[:Fn]^T
                pl.BlockSpec((f_edge, f_out_pad), lambda i, k: (0, 0)),            # W_neigh[Fn:]^T
            ],
            out_specs=pl.BlockSpec((tile_nd, f_out_pad), lambda i, k: (i, 0)),
            scratch_shapes=[
                pltpu.VMEM((tile_nd, f_neigh_aug), jnp.float32),                   # [neigh_sum | deg]
                pltpu.VMEM((tile_nd, f_edge), jnp.float32),                        # edge sums
            ],
        ),
        compiler_params=pltpu.CompilerParams(
            dimension_semantics=("parallel", "arbitrary"),   # dst tiles shard across v7x's 2 TCs
            vmem_limit_bytes=int(vmem_budget_bytes),
        ),
    )(adj_c, edge2d, hn_aug, hs, sel, w_self_t, w_n_aug, w_e_pad)

    return out_pad[:n_dst, :f_out]


def xavier_uniform(key, shape, gain):
    fan_out, fan_in = shape
    bound = gain * math.sqrt(6.0 / (fan_in + fan_out))
    return jax.random.uniform(key, shape, jnp.float32, -bound, bound)


def reference_forward(adj, edge_feats, h_neigh, h_self, w_self, w_neigh):
    """Pure f32 reference of the eval-mode 'mean' + norm=True forward."""
    deg = jnp.sum(adj, axis=1, keepdims=True)
    inv_deg = jnp.where(deg > 0.0, 1.0 / deg, 0.0)
    neigh = (adj @ h_neigh) * inv_deg
    edge = jnp.sum(edge_feats, axis=1) * inv_deg
    z = h_self @ w_self.T + jnp.concatenate([neigh, edge], axis=1) @ w_neigh.T
    z = jnp.maximum(z, 0.0)
    zn = jnp.linalg.norm(z, axis=1, keepdims=True)
    zn = jnp.where(zn == 0.0, 1.0, zn)
    return z / zn


def bf16_matched_reference(adj, edge_feats, h_neigh, h_self, w_self, w_neigh):
    """f32 math with the same bf16 roundings the kernel applies (streamed operands, intermediate
    means, weights), isolating kernel bugs from the deliberate bf16 streaming precision trade."""
    rnd = lambda x: x.astype(jnp.bfloat16).astype(jnp.float32)
    adj, edge_feats, h_neigh, h_self = rnd(adj), rnd(edge_feats), rnd(h_neigh), rnd(h_self)
    f_neigh = h_neigh.shape[1]
    deg = jnp.sum(adj, axis=1, keepdims=True)
    inv_deg = jnp.where(deg > 0.0, 1.0 / deg, 0.0)
    neigh = rnd((adj @ h_neigh) * inv_deg)
    edge = rnd(jnp.sum(edge_feats, axis=1) * inv_deg)
    z = (h_self @ rnd(w_self).T
         + neigh @ rnd(w_neigh[:, :f_neigh]).T
         + edge @ rnd(w_neigh[:, f_neigh:]).T)
    z = jnp.maximum(z, 0.0)
    zn = jnp.linalg.norm(z, axis=1, keepdims=True)
    zn = jnp.where(zn == 0.0, 1.0, zn)
    return z / zn


if __name__ == "__main__":
    # Small synthetic bipartite edge type (src -> dst); explicit tiles give a 2x2 grid so the
    # parallel-dst-tile + src-reduction-accumulator path is actually exercised, and the shapes
    # divide the tiles exactly so no wrapper padding pass over adj/edge happens.
    N_SRC, N_DST = 256, 32
    F_NEIGH, F_SELF, F_EDGE, F_OUT = 32, 16, 8, 32

    key = jax.random.PRNGKey(0)
    k_adj, k_edge, k_hn, k_hs, k_ws, k_wn = jax.random.split(key, 6)

    adj = jax.random.bernoulli(k_adj, 0.3, (N_DST, N_SRC)).astype(jnp.float32)
    adj = adj.at[3, :].set(0.0)                                     # isolated destination node
    edge_feats = jax.random.normal(k_edge, (N_DST, N_SRC, F_EDGE), jnp.float32)
    edge_feats = edge_feats * adj[:, :, None]                       # contract: zero where no edge

    h_neigh = jax.random.normal(k_hn, (N_SRC, F_NEIGH), jnp.float32)
    h_self = jax.random.normal(k_hs, (N_DST, F_SELF), jnp.float32)
    h_self = h_self.at[3, :].set(0.0)                               # exercises the zero-norm guard

    gain = math.sqrt(2.0)                                           # nn.init.calculate_gain('relu')
    w_self = xavier_uniform(k_ws, (F_OUT, F_SELF), gain)
    w_neigh = xavier_uniform(k_wn, (F_OUT, F_NEIGH + F_EDGE), gain)

    # TODO(synk): training-mode dropout and the non-'mean' aggregators (mean_nn/pool_nn/lstm/...)
    # are not implemented; eval-mode 'mean' + norm=True path only.
    out = conv_layer_forward(adj, edge_feats, h_neigh, h_self, w_self, w_neigh,
                             tile_nd=16, tile_ns=128)
    out = jax.block_until_ready(out)

    # Auto-tiled path (per-generation VMEM budget + derived tiles) must agree as well.
    out_auto = conv_layer_forward(adj, edge_feats, h_neigh, h_self, w_self, w_neigh)
    out_auto = jax.block_until_ready(out_auto)

    ref_bf16 = bf16_matched_reference(adj, edge_feats, h_neigh, h_self, w_self, w_neigh)
    ref_f32 = reference_forward(adj, edge_feats, h_neigh, h_self, w_self, w_neigh)

    np.testing.assert_allclose(np.asarray(out), np.asarray(ref_bf16), rtol=1e-3, atol=5e-4)
    np.testing.assert_allclose(np.asarray(out_auto), np.asarray(ref_bf16), rtol=1e-3, atol=5e-4)
    # Loose check vs the pure-f32 reference documents the deliberate bf16 streaming trade.
    np.testing.assert_allclose(np.asarray(out), np.asarray(ref_f32), rtol=5e-2, atol=2e-2)
    print("KERNEL_OK")
</pallas_src>

<mosaic_0001>
module attributes {stable_mosaic.version = 11 : i64} {
  func.func @conv_layer_kernel(%arg0: i32, %arg1: i32, %arg2: memref<16x128xbf16, #tpu.memory_space<vmem>>, %arg3: memref<16x1024xbf16, #tpu.memory_space<vmem>>, %arg4: memref<128x33xbf16, #tpu.memory_space<vmem>>, %arg5: memref<16x16xbf16, #tpu.memory_space<vmem>>, %arg6: memref<1024x8xbf16, #tpu.memory_space<vmem>>, %arg7: memref<16x128xbf16, #tpu.memory_space<vmem>>, %arg8: memref<33x128xbf16, #tpu.memory_space<vmem>>, %arg9: memref<8x128xbf16, #tpu.memory_space<vmem>>, %arg10: memref<16x128xf32, #tpu.memory_space<vmem>>, %arg11: memref<16x33xf32, #tpu.memory_space<vmem>>, %arg12: memref<16x8xf32, #tpu.memory_space<vmem>>) attributes {dimension_semantics = [#tpu.dimension_semantics<parallel>, #tpu.dimension_semantics<arbitrary>], iteration_bounds = array<i64: 2, 2>, scalar_prefetch = 0 : i64, scratch_operands = 2 : i64, tpu.core_type = #tpu.core_type<tc>, window_params = [{transform_indices = @transform_0, window_bounds = array<i64: 16, 128>}, {transform_indices = @transform_1, window_bounds = array<i64: 16, 1024>}, {transform_indices = @transform_2, window_bounds = array<i64: 128, 33>}, {transform_indices = @transform_3, window_bounds = array<i64: 16, 16>}, {pipeline_mode = #tpu.pipeline_mode<synchronous>, transform_indices = @transform_4, window_bounds = array<i64: 1024, 8>}, {pipeline_mode = #tpu.pipeline_mode<synchronous>, transform_indices = @transform_5, window_bounds = array<i64: 16, 128>}, {pipeline_mode = #tpu.pipeline_mode<synchronous>, transform_indices = @transform_6, window_bounds = array<i64: 33, 128>}, {pipeline_mode = #tpu.pipeline_mode<synchronous>, transform_indices = @transform_7, window_bounds = array<i64: 8, 128>}, {transform_indices = @transform_8, window_bounds = array<i64: 16, 128>}]} {
    %c0_i32 = arith.constant 0 : i32
    %0 = arith.cmpi eq, %arg1, %c0_i32 : i32
    %1 = arith.extui %0 : i1 to i32
    %c0_i32_0 = arith.constant 0 : i32
    %2 = arith.cmpi ne, %1, %c0_i32_0 : i32
    scf.if %2 {
      %cst_18 = arith.constant 0.000000e+00 : f32
      %18 = vector.broadcast %cst_18 : f32 to vector<16x33xf32>
      %c0_19 = arith.constant 0 : index
      %c0_20 = arith.constant 0 : index
      %19 = vector.load %arg11[%c0_19, %c0_20] : memref<16x33xf32, #tpu.memory_space<vmem>>, vector<16x33xf32>
      tpu.vector_store %arg11[%c0_19, %c0_20], %18 {strides = array<i32>} : memref<16x33xf32, #tpu.memory_space<vmem>>, vector<16x33xf32>,
      %cst_21 = arith.constant 0.000000e+00 : f32
      %20 = vector.broadcast %cst_21 : f32 to vector<16x8xf32>
      %c0_22 = arith.constant 0 : index
      %c0_23 = arith.constant 0 : index
      %21 = vector.load %arg12[%c0_22, %c0_23] : memref<16x8xf32, #tpu.memory_space<vmem>>, vector<16x8xf32>
      tpu.vector_store %arg12[%c0_22, %c0_23], %20 {strides = array<i32>} : memref<16x8xf32, #tpu.memory_space<vmem>>, vector<16x8xf32>,
    } else {
    }
    %c0 = arith.constant 0 : index
    %c0_1 = arith.constant 0 : index
    %3 = vector.load %arg11[%c0, %c0_1] : memref<16x33xf32, #tpu.memory_space<vmem>>, vector<16x33xf32>
    %c0_2 = arith.constant 0 : index
    %c0_3 = arith.constant 0 : index
    %4 = vector.load %arg2[%c0_2, %c0_3] : memref<16x128xbf16, #tpu.memory_space<vmem>>, vector<16x128xbf16>
    %c0_4 = arith.constant 0 : index
    %c0_5 = arith.constant 0 : index
    %5 = vector.load %arg4[%c0_4, %c0_5] : memref<128x33xbf16, #tpu.memory_space<vmem>>, vector<128x33xbf16>
    %cst = arith.constant dense<0.000000e+00> : vector<16x33xf32>
    %6 = tpu.matmul %4, %5, %cst {dimension_numbers = #tpu.dot_dimension_numbers<[1], [0], [0], [1], [0, 0, 1, 1], [], []>} : vector<16x128xbf16>, vector<128x33xbf16>, vector<16x33xf32> -> vector<16x33xf32>
    %7 = arith.addf %3, %6 : vector<16x33xf32>
    %c0_6 = arith.constant 0 : index
    %c0_7 = arith.constant 0 : index
    %8 = vector.load %arg11[%c0_6, %c0_7] : memref<16x33xf32, #tpu.memory_space<vmem>>, vector<16x33xf32>
    tpu.vector_store %arg11[%c0_6, %c0_7], %7 {strides = array<i32>} : memref<16x33xf32, #tpu.memory_space<vmem>>, vector<16x33xf32>,
    %c0_8 = arith.constant 0 : index
    %c0_9 = arith.constant 0 : index
    %9 = vector.load %arg12[%c0_8, %c0_9] : memref<16x8xf32, #tpu.memory_space<vmem>>, vector<16x8xf32>
    %c0_10 = arith.constant 0 : index
    %c0_11 = arith.constant 0 : index
    %10 = vector.load %arg3[%c0_10, %c0_11] : memref<16x1024xbf16, #tpu.memory_space<vmem>>, vector<16x1024xbf16>
    %c0_12 = arith.constant 0 : index
    %c0_13 = arith.constant 0 : index
    %11 = vector.load %arg6[%c0_12, %c0_13] : memref<1024x8xbf16, #tpu.memory_space<vmem>>, vector<1024x8xbf16>
    %cst_14 = arith.constant dense<0.000000e+00> : vector<16x8xf32>
    %12 = tpu.matmul %10, %11, %cst_14 {dimension_numbers = #tpu.dot_dimension_numbers<[1], [0], [0], [1], [0, 0, 1, 1], [], []>} : vector<16x1024xbf16>, vector<1024x8xbf16>, vector<16x8xf32> -> vector<16x8xf32>
    %13 = arith.addf %9, %12 : vector<16x8xf32>
    %c0_15 = arith.constant 0 : index
    %c0_16 = arith.constant 0 : index
    %14 = vector.load %arg12[%c0_15, %c0_16] : memref<16x8xf32, #tpu.memory_space<vmem>>, vector<16x8xf32>
    tpu.vector_store %arg12[%c0_15, %c0_16], %13 {strides = array<i32>} : memref<16x8xf32, #tpu.memory_space<vmem>>, vector<16x8xf32>,
    %c1_i32 = arith.constant 1 : i32
    %15 = arith.cmpi eq, %arg1, %c1_i32 : i32
    %16 = arith.extui %15 : i1 to i32
    %c0_i32_17 = arith.constant 0 : i32
    %17 = arith.cmpi ne, %16, %c0_i32_17 : i32
    scf.if %17 {
      %c0_18 = arith.constant 0 : index
      %c0_19 = arith.constant 0 : index
      %18 = vector.load %arg11[%c0_18, %c0_19] : memref<16x33xf32, #tpu.memory_space<vmem>>, vector<16x33xf32>
      %19 = vector.extract_strided_slice %18 {offsets = [0, 32], sizes = [16, 1], strides = [1, 1]} : vector<16x33xf32> to vector<16x1xf32>
      %cst_20 = arith.constant 0.000000e+00 : f32
      %20 = vector.broadcast %cst_20 : f32 to vector<16x1xf32>
      %21 = arith.cmpf ogt, %19, %20 : vector<16x1xf32>
      %cst_21 = arith.constant 1.000000e+00 : f32
      %22 = vector.broadcast %cst_21 : f32 to vector<16x1xf32>
      %23 = arith.divf %22, %19 : vector<16x1xf32>
      %cst_22 = arith.constant 0.000000e+00 : f32
      %24 = vector.broadcast %cst_22 : f32 to vector<16x1xf32>
      %25 = arith.select %21, %23, %24 : vector<16x1xi1>, vector<16x1xf32>
      %26 = vector.broadcast %25 : vector<16x1xf32> to vector<16x33xf32>
      %27 = arith.mulf %18, %26 : vector<16x33xf32>
      %28 = arith.truncf %27 : vector<16x33xf32> to vector<16x33xbf16>
      %c0_23 = arith.constant 0 : index
      %c0_24 = arith.constant 0 : index
      %29 = vector.load %arg12[%c0_23, %c0_24] : memref<16x8xf32, #tpu.memory_space<vmem>>, vector<16x8xf32>
      %30 = vector.broadcast %25 : vector<16x1xf32> to vector<16x8xf32>
      %31 = arith.mulf %29, %30 : vector<16x8xf32>
      %32 = arith.truncf %31 : vector<16x8xf32> to vector<16x8xbf16>
      %c0_25 = arith.constant 0 : index
      %c0_26 = arith.constant 0 : index
      %33 = vector.load %arg5[%c0_25, %c0_26] : memref<16x16xbf16, #tpu.memory_space<vmem>>, vector<16x16xbf16>
      %c0_27 = arith.constant 0 : index
      %c0_28 = arith.constant 0 : index
      %34 = vector.load %arg7[%c0_27, %c0_28] : memref<16x128xbf16, #tpu.memory_space<vmem>>, vector<16x128xbf16>
      %cst_29 = arith.constant dense<0.000000e+00> : vector<16x128xf32>
      %35 = tpu.matmul %33, %34, %cst_29 {dimension_numbers = #tpu.dot_dimension_numbers<[1], [0], [0], [1], [0, 0, 1, 1], [], []>} : vector<16x16xbf16>, vector<16x128xbf16>, vector<16x128xf32> -> vector<16x128xf32>
      %c0_30 = arith.constant 0 : index
      %c0_31 = arith.constant 0 : index
      %36 = vector.load %arg8[%c0_30, %c0_31] : memref<33x128xbf16, #tpu.memory_space<vmem>>, vector<33x128xbf16>
      %cst_32 = arith.constant dense<0.000000e+00> : vector<16x128xf32>
      %37 = tpu.matmul %28, %36, %cst_32 {dimension_numbers = #tpu.dot_dimension_numbers<[1], [0], [0], [1], [0, 0, 1, 1], [], []>} : vector<16x33xbf16>, vector<33x128xbf16>, vector<16x128xf32> -> vector<16x128xf32>
      %38 = arith.addf %35, %37 : vector<16x128xf32>
      %c0_33 = arith.constant 0 : index
      %c0_34 = arith.constant 0 : index
      %39 = vector.load %arg9[%c0_33, %c0_34] : memref<8x128xbf16, #tpu.memory_space<vmem>>, vector<8x128xbf16>
      %cst_35 = arith.constant dense<0.000000e+00> : vector<16x128xf32>
      %40 = tpu.matmul %32, %39, %cst_35 {dimension_numbers = #tpu.dot_dimension_numbers<[1], [0], [0], [1], [0, 0, 1, 1], [], []>} : vector<16x8xbf16>, vector<8x128xbf16>, vector<16x128xf32> -> vector<16x128xf32>
      %41 = arith.addf %38, %40 : vector<16x128xf32>
      %cst_36 = arith.constant 0.000000e+00 : f32
      %42 = vector.broadcast %cst_36 : f32 to vector<16x128xf32>
      %43 = arith.maximumf %41, %42 : vector<16x128xf32>
      %44 = arith.mulf %43, %43 : vector<16x128xf32>
      %cst_37 = arith.constant dense<0.000000e+00> : vector<16xf32>
      %45 = vector.multi_reduction <add>, %44, %cst_37 [1] : vector<16x128xf32> to vector<16xf32>
      %46 = vector.shape_cast %45 : vector<16xf32> to vector<16x1xf32>
      %cst_38 = arith.constant 0.000000e+00 : f32
      %47 = vector.broadcast %cst_38 : f32 to vector<16x1xf32>
      %48 = arith.cmpf ogt, %46, %47 : vector<16x1xf32>
      %49 = math.rsqrt %46 : vector<16x1xf32>
      %cst_39 = arith.constant 1.000000e+00 : f32
      %50 = vector.broadcast %cst_39 : f32 to vector<16x1xf32>
      %51 = arith.select %48, %49, %50 : vector<16x1xi1>, vector<16x1xf32>
      %52 = vector.broadcast %51 : vector<16x1xf32> to vector<16x128xf32>
      %53 = arith.mulf %43, %52 : vector<16x128xf32>
      %c0_40 = arith.constant 0 : index
      %c0_41 = arith.constant 0 : index
      %54 = vector.load %arg10[%c0_40, %c0_41] : memref<16x128xf32, #tpu.memory_space<vmem>>, vector<16x128xf32>
      tpu.vector_store %arg10[%c0_40, %c0_41], %53 {strides = array<i32>} : memref<16x128xf32, #tpu.memory_space<vmem>>, vector<16x128xf32>,
    } else {
    }
    return
  }
  func.func @transform_0(%arg0: i32, %arg1: i32) -> (i32, i32) {
    %c0_i32 = arith.constant 0 : i32
    return %arg0, %arg1 : i32, i32
  }
  func.func @transform_1(%arg0: i32, %arg1: i32) -> (i32, i32) {
    %c0_i32 = arith.constant 0 : i32
    return %arg0, %arg1 : i32, i32
  }
  func.func @transform_2(%arg0: i32, %arg1: i32) -> (i32, i32) {
    %c0_i32 = arith.constant 0 : i32
    %c0_i32_0 = arith.constant 0 : i32
    return %arg1, %c0_i32 : i32, i32
  }
  func.func @transform_3(%arg0: i32, %arg1: i32) -> (i32, i32) {
    %c0_i32 = arith.constant 0 : i32
    %c0_i32_0 = arith.constant 0 : i32
    return %arg0, %c0_i32 : i32, i32
  }
  func.func @transform_4(%arg0: i32, %arg1: i32) -> (i32, i32) {
    %c0_i32 = arith.constant 0 : i32
    %c0_i32_0 = arith.constant 0 : i32
    %c0_i32_1 = arith.constant 0 : i32
    return %c0_i32, %c0_i32_0 : i32, i32
  }
  func.func @transform_5(%arg0: i32, %arg1: i32) -> (i32, i32) {
    %c0_i32 = arith.constant 0 : i32
    %c0_i32_0 = arith.constant 0 : i32
    %c0_i32_1 = arith.constant 0 : i32
    return %c0_i32, %c0_i32_0 : i32, i32
  }
  func.func @transform_6(%arg0: i32, %arg1: i32) -> (i32, i32) {
    %c0_i32 = arith.constant 0 : i32
    %c0_i32_0 = arith.constant 0 : i32
    %c0_i32_1 = arith.constant 0 : i32
    return %c0_i32, %c0_i32_0 : i32, i32
  }
  func.func @transform_7(%arg0: i32, %arg1: i32) -> (i32, i32) {
    %c0_i32 = arith.constant 0 : i32
    %c0_i32_0 = arith.constant 0 : i32
    %c0_i32_1 = arith.constant 0 : i32
    return %c0_i32, %c0_i32_0 : i32, i32
  }
  func.func @transform_8(%arg0: i32, %arg1: i32) -> (i32, i32) {
    %c0_i32 = arith.constant 0 : i32
    %c0_i32_0 = arith.constant 0 : i32
    return %arg0, %c0_i32 : i32, i32
  }
}

</mosaic_0001>

<bundles_post_ra>
// kernel: tpu_custom_call.1
= control target key start
LH: loop header
LB: loop body
LE: loop exit
PB: predicated region body
PF: predicated region fallthrough
CT: control target
= control target key end

     0   :  { %s2761_s0 = inlined_call_operand.vmem [shape: bf16[32,256], index: 0, kind: input, shape index: {}]   ;;  %s2762_s1 = inlined_call_operand.vmem [shape: bf16[32,2048], index: 1, kind: input, shape index: {}]   ;;  %s2763_s2 = inlined_call_operand.vmem [shape: bf16[256,33], index: 2, kind: input, shape index: {}]   ;;  %s2764_s3 = inlined_call_operand.vmem [shape: bf16[32,16], index: 3, kind: input, shape index: {}]   ;;  %s2765_s4 = inlined_call_operand.vmem [shape: bf16[1024,8], index: 4, kind: input, shape index: {}]   ;;  %s2766_s5 = inlined_call_operand.vmem [shape: bf16[16,128], index: 5, kind: input, shape index: {}]   ;;  %s2767_s6 = inlined_call_operand.vmem [shape: bf16[33,128], index: 6, kind: input, shape index: {}]   ;;  %s2768_s7 = inlined_call_operand.vmem [shape: bf16[8,128], index: 7, kind: input, shape index: {}]   ;;  %s2769_s8 = inlined_call_operand.hbm [shape: f32[32,128], index: 8, kind: output, shape index: {}]  }
   0x1   :  { %2776 = sst [smem:[#allocation16_spill]] %s2761_s0 }
   0x2   :  { %2777 = sst [smem:[#allocation17_spill]] %s2762_s1 }
   0x3   :  { %13 = vsyncpa [#allocation7], 0 }
   0x4   :  { %15 = vsyncpa [#allocation7 + $0x1], 0  ;;  %s2316_s27 = smov 0   ;;  %s2318_s28 = smov 0  }
   0x5   :  { %s2320_s29 = smov 0   ;;  %s2322_s30 = smov 0  }
   0x6   :  { %s2324_s9 = smov 0   ;;  %s2326_s10 = smov 0  }
   0x7   :  { %s2328_s11 = smov 0   ;;  %s2330_s12 = smov 0  }
   0x8   :  { %s2332_s13 = smov 0   ;;  %s2334_s14 = smov 0  }
   0x9 LB: > { %2778 = sst [smem:[#allocation9_spill]] %s2228_s27  ;;  %s1594_s15 = sadd.s32 4294967295, %s2264_s14   ;;  %s2264_s14 = sphi %s2334_s14, %s21_s14   ;;  %s2260_s13 = sphi %s2332_s13, %s2805_s13   ;;  %s2256_s12 = sphi %s2330_s12, %s2804_s12   ;;  %s2252_s11 = sphi %s2328_s11, %s2803_s11   ;;  %s2248_s10 = sphi %s2326_s10, %s2802_s10   ;;  %s2244_s9 = sphi %s2324_s9, %s2801_s9   ;;  %s2240_s30 = sphi %s2322_s30, %s2800_s30   ;;  %s2236_s29 = sphi %s2320_s29, %s2794_s29   ;;  %s2232_s28 = sphi %s2318_s28, %s2799_s28   ;;  %s2228_s27 = sphi %s2316_s27, %s2798_s27  }
   0xa   : > { %2779 = sst [smem:[#allocation10_spill]] %s2236_s29  ;;  %s1595_s16 = sadd.s32 4294967294, %s2264_s14  }
   0xb   : > { %s30_s17 = sadd.s32 1, %s2256_s12  ;;  %s33_s18 = sadd.s32 1, %s2260_s13 }
   0xc   : > { %p31_p0 = scmp.ge.s32.totalorder %s30_s17, 2  ;;  %s42_s19 = sadd.s32 1, %s2244_s9 }
   0xd   : > { %p49_p1 = scmp.ne.s32.totalorder %s2244_s9, %s2240_s30  ;;  %p50_p2 = scmp.eq.s32.totalorder %s2264_s14, 0 }
   0xe   : > { %s2807_s17 = smov (%p31_p0, %s30_s17), 0  ;;  %s2809_s18 = smov (!%p31_p0, %s33_s18), %s2260_s13 }
   0xf   : > { %2780 = sst [smem:[#allocation11_spill]] %s2807_s17  ;;  %s38_s20 = ssub.s32 %s2256_s12, %s2807_s17 }
  0x10   : > { %p2379_p3 = por %p50_p2, %p49_p1  ;;  %p35_p4 = scmp.ge.s32.totalorder %s2809_s18, 2 }
  0x11   : > { %s232_s22 = sadd.s32 1, %s2236_s29  ;;  %p242_p5 = scmp.ne.s32.totalorder %s2236_s29, %s2232_s28 }
  0x12   : > { %p243_p6 = scmp.eq.s32.totalorder %s1594_s15, 3  ;;  %s2811_s18 = smov (%p35_p4, %s2809_s18), 0 }
  0x13   : > { %2782 = sst [smem:[#allocation12_spill]] %s2811_s18  ;;  %p248_p8 = scmp.ne.s32.totalorder %s2232_s28, %s2228_s27 }
  0x14   : > { %p2388_p7 = por %p243_p6, %p242_p5  ;;  %s37_s24 = ssub.s32 %s2260_s13, %s2811_s18 }
  0x15   : > { %p249_p9 = scmp.eq.s32.totalorder %s1595_s16, 3  ;;  %s39_s25 = sor.u32 %s38_s20, %s37_s24 }
  0x16   : > { %p230_p10 = scmp.eq.s32.totalorder %s37_s24, 0  ;;  %p40_p11 = scmp.eq.s32.totalorder %s39_s25, 0 }
  0x17   : > { %p2396_p12 = por %p249_p9, %p248_p8  ;;  %p1597_p13 = scmp.ge.s32.totalorder %s2264_s14, 4 }
  0x18   : > { %s2401_s17 = scalar_select %p230_p10, %s2236_s29, %s232_s22  }
  0x19   : > { %s2784_s26 = scalar_select %p2396_p12, 1, 0 }
  0x1a   : > { %2786 = sst [smem:[#allocation14_spill]] %s2401_s17  ;;  %277 = sbr.rel (%p1597_p13) target bundleno = 61 (0x3d), region = 32 }
  0x1b   : > { %2785 = sst [smem:[#allocation13_spill]] %s2784_s26 }
  0x1c   : > { %s2404_s15 = scalar_select %p40_p11, %s2244_s9, %s42_s19  }
  0x1e   : > { %2787 = sst [smem:[#allocation15_spill]] %s2404_s15 }
  0x1f   : > { %280 = sbr.rel (!%p2379_p3) target bundleno = 43 (0x2b), region = 36  ;;  %s282_s16 = sand.u32 (%p2379_p3), 1, %s2244_s9  }
  0x20   : > { %s1965_s20 = sshll.u32 (%p2379_p3), %s2260_s13, 2  ;;  %s1598_s24 = sshll.u32 (%p2379_p3), %s282_s16, 3 }
  0x21   : > { %s287_s25 = sadd.s32 (%p2379_p3), %s2256_s12, %s1965_s20  ;;  %s2788_s0 = sld [smem:[#allocation16_spill]] (%p2379_p3) }
  0x22   : > { %s1601_s18 = sshll.u32 (%p2379_p3), %s287_s25, 2  ;;  %s284_s19 = scalar_lea.vmem (%p2379_p3), [#allocation4], %s1598_s24 }
  0x27   : > { %s289_s22 = scalar_lea.vmem %s2788_s0, %s1601_s18 }
  0x28   : > { %v306_v0 = vld [vmem:[%s289_s22] sm:$0xf]  ;;  %v308_v1 = vld [vmem:[%s289_s22 + $0x8] sm:$0xf] }
  0x29   : > { %307 = vst [vmem:[%s284_s19] sm:$0xf] %v306_v0 }
  0x2a   : > { %309 = vst [vmem:[%s284_s19 + $0x4] sm:$0xf] %v308_v1 }
  0x2b PF: > { %337 = sbr.rel (!%p2379_p3) target bundleno = 61 (0x3d), region = 77  ;;  %s339_s15 = sand.u32 (%p2379_p3), 1, %s2244_s9  }
  0x2c   : > { %s1604_s16 = sshll.u32 (%p2379_p3), %s2256_s12, 3  ;;  %s1602_s20 = sshll.u32 (%p2379_p3), %s339_s15, 6 }
  0x2d   : > { %s1966_s25 = sshll.u32 (%p2379_p3), %s2260_s13, 5  ;;  %s2789_s1 = sld [smem:[#allocation17_spill]] (%p2379_p3) }
  0x2e   : > { %s345_s17 = sadd.s32 (%p2379_p3), %s1966_s25, %s1604_s16  ;;  %s341_s24 = scalar_lea.vmem (%p2379_p3), [#allocation5], %s1602_s20 }
  0x2f   : > { %s1606_s29 = sshll.u32 (%p2379_p3), %s345_s17, 2 }
  0x33   : > { %s347_s26 = scalar_lea.vmem %s2789_s1, %s1606_s29 }
  0x34   : > { %v360_v2 = vld [vmem:[%s347_s26] sm:$0xff]  ;;  %v362_v3 = vld [vmem:[%s347_s26 + $0x8] sm:$0xff]  ;;  %v364_v4 = vld [vmem:[%s347_s26 + $0x10] sm:$0xff] }
  0x35   : > { %361 = vst [vmem:[%s341_s24] sm:$0xff] %v360_v2  ;;  %v366_v5 = vld [vmem:[%s347_s26 + $0x18] sm:$0xff]  ;;  %v368_v6 = vld [vmem:[%s347_s26 + $0x40] sm:$0xff]  ;;  %v370_v7 = vld [vmem:[%s347_s26 + $0x48] sm:$0xff] }
  0x36   : > { %363 = vst [vmem:[%s341_s24 + $0x8] sm:$0xff] %v362_v3  ;;  %v372_v8 = vld [vmem:[%s347_s26 + $0x50] sm:$0xff]  ;;  %v374_v9 = vld [vmem:[%s347_s26 + $0x58] sm:$0xff] }
  0x37   : > { %365 = vst [vmem:[%s341_s24 + $0x10] sm:$0xff] %v364_v4 }
  0x38   : > { %367 = vst [vmem:[%s341_s24 + $0x18] sm:$0xff] %v366_v5 }
  0x39   : > { %369 = vst [vmem:[%s341_s24 + $0x20] sm:$0xff] %v368_v6 }
  0x3a   : > { %371 = vst [vmem:[%s341_s24 + $0x28] sm:$0xff] %v370_v7 }
  0x3b   : > { %373 = vst [vmem:[%s341_s24 + $0x30] sm:$0xff] %v372_v8 }
  0x3c   : > { %375 = vst [vmem:[%s341_s24 + $0x38] sm:$0xff] %v374_v9 }
  0x3d PF: > { %p1607_p0 = scmp.ge.s32.totalorder %s2264_s14, 1  ;;  %p398_p1 = scmp.lt.s32.totalorder %s2264_s14, 5 }
  0x3f   : > { %p399_p2 = pnand %p1607_p0, %p398_p1 }
  0x40   : > { %s405_s29 = sand.u32 (!%p399_p2), 1, %s2240_s30   ;;  %s2775_s17 = sand.u32 (!%p399_p2), 1, %s2232_s28  }
  0x41   : > { %402 = sbr.rel (%p399_p2) target bundleno = 766 (0x2fe), region = 108  ;;  %s2427_s21 = sshll.u32 (!%p399_p2), %s405_s29, 3 }
  0x42   : > { %s1609_s15 = sshll.u32 (!%p399_p2), %s405_s29, 6  ;;  %s1610_s22 = sshll.u32 (!%p399_p2), %s2775_s17, 4 }
  0x43   : > { %s1611_s19 = sshll.u32 (!%p399_p2), %s2248_s10, 4  ;;  %s1613_s16 = sshll.u32 (!%p399_p2), %s2252_s11, 1 }
  0x44   : > { %p463_p3 = scmp.lt.s32.totalorder (!%p399_p2), %s1611_s19, 31  ;;  %p469_p4 = scmp.lt.s32.totalorder (!%p399_p2), %s1613_s16, 3 }
  0x45   : > { %s407_s29 = scalar_lea.vmem (!%p399_p2), [#allocation4], %s2427_s21  ;;  %s2444_s17 = scalar_lea.vmem (!%p399_p2), [#allocation5], %s1609_s15 }
  0x46   : > { %s2813_s19 = smov (!%p463_p3, %s1611_s19), 31  ;;  %s2815_s16 = smov (!%p469_p4, %s1613_s16), 3 }
  0x47   : > { %s1612_s20 = sshll.u32 %s2813_s19, 2  ;;  %s1614_s30 = sshll.u32 %s2815_s16, 2 }
  0x48   : > { %s2436_s18 = scalar_lea.vmem %s2763_s2, %s1612_s20  ;;  %s2441_s0 = scalar_lea.vmem %s2764_s3, %s1614_s30 }
  0x49   : > { %s2446_s1 = scalar_lea.vmem [#allocation6], %s1610_s22  ;;  %p1615_p5 = scmp.ne.s32.totalorder %s2248_s10, 0 }
  0x4b   : > { %479 = sbr.rel (%p1615_p5) target bundleno = 85 (0x55), region = 120 }
  0x50   : > { %vm480_vm0 = vcmask 269312   ;;  %vm483_vm1 = vcmask 64512   ;;  %v2266_v10 = vmov 0.0  }
  0x51   : > { %481 = vst.msk [vmem:[#allocation2] sm:$0xff] %vm480_vm0, %v2266_v10 }
  0x52   : > { %482 = vst.msk [vmem:[#allocation2 + $0x8] sm:$0xff] %vm480_vm0, %v2266_v10 }
  0x53   : > { %484 = vst.msk [vmem:[#allocation3] sm:$0xff] %vm483_vm1, %v2266_v10 }
  0x54   : > { %485 = vst.msk [vmem:[#allocation3 + $0x8] sm:$0xff] %vm483_vm1, %v2266_v10 }
  0x55 PF: > { %v1975_v11 = vld [vmem:[%s2436_s18 + $0x38] sm:$0xff]  ;;  %v1974_v15 = vld [vmem:[%s2436_s18 + $0x30] sm:$0xff]  ;;  %v1973_v19 = vld [vmem:[%s2436_s18 + $0x28] sm:$0xff]  ;;  %vm576_vm2 = vcmask 269312   ;;  %vm1255_vm3 = vcmask 64512   ;;  %p1940_p6 = scmp.ne.s32.totalorder %s2248_s10, 1 }
  0x56   : > { %v1999_v12 = vld [vmem:[%s2765_s4 + $0x78] sm:$0xff]  ;;  %560 = vmatpush.bf16.msra.mxu0 %v1975_v11  ;;  %v1998_v16 = vld [vmem:[%s2765_s4 + $0x70] sm:$0xff]  ;;  %v1997_v20 = vld [vmem:[%s2765_s4 + $0x68] sm:$0xff] }
  0x57   : > { %v2007_v13 = vld [vmem:[%s2765_s4 + $0xb8] sm:$0xff]  ;;  %1155 = vmatpush.bf16.msra.mxu2 %v1999_v12  ;;  %v2006_v17 = vld [vmem:[%s2765_s4 + $0xb0] sm:$0xff]  ;;  %v2005_v21 = vld [vmem:[%s2765_s4 + $0xa8] sm:$0xff] }
  0x58   : > { %v1991_v14 = vld [vmem:[%s2765_s4 + $0x38] sm:$0xff]  ;;  %1169 = vmatpush.bf16.msra.mxu3 %v2007_v13  ;;  %v1990_v18 = vld [vmem:[%s2765_s4 + $0x30] sm:$0xff]  ;;  %v1989_v22 = vld [vmem:[%s2765_s4 + $0x28] sm:$0xff] }
  0x59   : > { %1141 = vmatpush.bf16.msra.mxu1 %v1991_v14  ;;  %v1972_v23 = vld [vmem:[%s2436_s18 + $0x20] sm:$0xff]  ;;  %v1971_v27 = vld [vmem:[%s2436_s18 + $0x18] sm:$0xff]  ;;  %v1970_v31 = vld [vmem:[%s2436_s18 + $0x10] sm:$0xff] }
  0x5a   : > { %561 = vmatpush.bf16.msra.mxu0 %v1974_v15  ;;  %v1996_v24 = vld [vmem:[%s2765_s4 + $0x60] sm:$0xff]  ;;  %v1995_v28 = vld [vmem:[%s2765_s4 + $0x58] sm:$0xff]  ;;  %v1994_v32 = vld [vmem:[%s2765_s4 + $0x50] sm:$0xff] }
  0x5b   : > { %1156 = vmatpush.bf16.msra.mxu2 %v1998_v16  ;;  %v2004_v25 = vld [vmem:[%s2765_s4 + $0xa0] sm:$0xff]  ;;  %v2003_v29 = vld [vmem:[%s2765_s4 + $0x98] sm:$0xff]  ;;  %v2002_v33 = vld [vmem:[%s2765_s4 + $0x90] sm:$0xff] }
  0x5c   : > { %1170 = vmatpush.bf16.msra.mxu3 %v2006_v17  ;;  %v1988_v26 = vld [vmem:[%s2765_s4 + $0x20] sm:$0xff]  ;;  %v1987_v30 = vld [vmem:[%s2765_s4 + $0x18] sm:$0xff]  ;;  %v1986_v34 = vld [vmem:[%s2765_s4 + $0x10] sm:$0xff] }
  0x5d   : > { %1142 = vmatpush.bf16.msra.mxu1 %v1990_v18  ;;  %v1969_v35 = vld [vmem:[%s2436_s18 + $0x8] sm:$0xff]  ;;  %v1968_v39 = vld [vmem:[%s2436_s18] sm:$0xff]  ;;  %v2015_v41 = vld [vmem:[%s2765_s4 + $0xf8] sm:$0xff] }
  0x5e   : > { %562 = vmatpush.bf16.msra.mxu0 %v1973_v19  ;;  %v1993_v36 = vld [vmem:[%s2765_s4 + $0x48] sm:$0xff]  ;;  %v1992_v40 = vld [vmem:[%s2765_s4 + $0x40] sm:$0xff]  ;;  %v2031_v42 = vld [vmem:[%s2765_s4 + $0x178] sm:$0xff] }
  0x5f   : > { %1157 = vmatpush.bf16.msra.mxu2 %v1997_v20  ;;  %v2001_v37 = vld [vmem:[%s2765_s4 + $0x88] sm:$0xff]  ;;  %v2000_v43 = vld [vmem:[%s2765_s4 + $0x80] sm:$0xff]  ;;  %v2039_v44 = vld [vmem:[%s2765_s4 + $0x1b8] sm:$0xff] }
  0x60   : > { %1171 = vmatpush.bf16.msra.mxu3 %v2005_v21  ;;  %v1985_v38 = vld [vmem:[%s2765_s4 + $0x8] sm:$0xff]  ;;  %v1976_v45 = vld [vmem:[%s2444_s17 + $0x4] sm:$0xf]  ;;  %v1984_v47 = vld [vmem:[%s2765_s4] sm:$0xff] }
  0x61   : > { %1143 = vmatpush.bf16.msra.mxu1 %v1989_v22  ;;  %v1656_v46 = vld [vmem:[%s2444_s17 + $0x20] sm:$0xf0]  ;;  %v2023_v48 = vld [vmem:[%s2765_s4 + $0x138] sm:$0xff]  ;;  %v1654_v51 = vld [vmem:[%s2444_s17] sm:$0xf] }
  0x62   : > { %563 = vmatpush.bf16.msra.mxu0 %v1972_v23  ;;  %v1662_v49 = vld [vmem:[%s2444_s17 + $0x8] sm:$0xf]  ;;  %v1980_v52 = vld [vmem:[%s2444_s17 + $0x1c] sm:$0xf0]  ;;  %v1659_v53 = vor.u32 %v1976_v45, %v1656_v46  ;;  %v1967_v54 = vld [vmem:[%s407_s29] sm:$0xff] }
  0x63   : > { %1158 = vmatpush.bf16.msra.mxu2 %v1996_v24  ;;  %v1981_v50 = vld [vmem:[%s2444_s17 + $0x24] sm:$0xf0]  ;;  %v2014_v55 = vld [vmem:[%s2765_s4 + $0xf0] sm:$0xff]  ;;  %v1655_v58 = vor.u32 %v1980_v52, %v1654_v51  ;;  %v2013_v61 = vld [vmem:[%s2765_s4 + $0xe8] sm:$0xff] }
  0x64   : > { %1172 = vmatpush.bf16.msra.mxu3 %v2004_v25  ;;  %v2030_v56 = vld [vmem:[%s2765_s4 + $0x170] sm:$0xff]  ;;  %v1663_v57 = vor.u32 %v1981_v50, %v1662_v49  ;;  %v2029_v62 = vld [vmem:[%s2765_s4 + $0x168] sm:$0xff]  ;;  %v2012_v1 = vld [vmem:[%s2765_s4 + $0xe0] sm:$0xff] }
  0x65   : > { %1144 = vmatpush.bf16.msra.mxu1 %v1988_v26  ;;  %v2038_v59 = vld [vmem:[%s2765_s4 + $0x1b0] sm:$0xff]  ;;  %v2037_v63 = vld [vmem:[%s2765_s4 + $0x1a8] sm:$0xff]  ;;  %v2028_v2 = vld [vmem:[%s2765_s4 + $0x160] sm:$0xff] }
  0x66   : > { %564 = vmatpush.bf16.msra.mxu0 %v1971_v27  ;;  %v2022_v60 = vld [vmem:[%s2765_s4 + $0x130] sm:$0xff]  ;;  %v2021_v0 = vld [vmem:[%s2765_s4 + $0x128] sm:$0xff]  ;;  %v2036_v3 = vld [vmem:[%s2765_s4 + $0x1a0] sm:$0xff] }
  0x67   : > { %1159 = vmatpush.bf16.msra.mxu2 %v1995_v28  ;;  %v2020_v4 = vld [vmem:[%s2765_s4 + $0x120] sm:$0xff]  ;;  %v2011_v5 = vld [vmem:[%s2765_s4 + $0xd8] sm:$0xff]  ;;  %v2010_v9 = vld [vmem:[%s2765_s4 + $0xd0] sm:$0xff] }
  0x68   : > { %1173 = vmatpush.bf16.msra.mxu3 %v2003_v29  ;;  %v2027_v6 = vld [vmem:[%s2765_s4 + $0x158] sm:$0xff]  ;;  %v2026_v10 = vld [vmem:[%s2765_s4 + $0x150] sm:$0xff]  ;;  %v2009_v13 = vld [vmem:[%s2765_s4 + $0xc8] sm:$0xff] }
  0x69   : > { %1145 = vmatpush.bf16.msra.mxu1 %v1987_v30  ;;  %v2035_v7 = vld [vmem:[%s2765_s4 + $0x198] sm:$0xff]  ;;  %v2034_v11 = vld [vmem:[%s2765_s4 + $0x190] sm:$0xff]  ;;  %v2025_v14 = vld [vmem:[%s2765_s4 + $0x148] sm:$0xff] }
  0x6a   : > { %565 = vmatpush.bf16.msra.mxu0 %v1970_v31  ;;  %v2019_v8 = vld [vmem:[%s2765_s4 + $0x118] sm:$0xff]  ;;  %v2018_v12 = vld [vmem:[%s2765_s4 + $0x110] sm:$0xff]  ;;  %v2033_v15 = vld [vmem:[%s2765_s4 + $0x188] sm:$0xff] }
  0x6b   : > { %1160 = vmatpush.bf16.msra.mxu2 %v1994_v32  ;;  %v2017_v16 = vld [vmem:[%s2765_s4 + $0x108] sm:$0xff]  ;;  %v2008_v17 = vld [vmem:[%s2765_s4 + $0xc0] sm:$0xff]  ;;  %v1977_v21 = vld [vmem:[%s2444_s17 + $0xc] sm:$0xf] }
  0x6c   : > { %1174 = vmatpush.bf16.msra.mxu3 %v2002_v33  ;;  %v2024_v18 = vld [vmem:[%s2765_s4 + $0x140] sm:$0xff]  ;;  %v1664_v22 = vld [vmem:[%s2444_s17 + $0x28] sm:$0xf0]  ;;  %v1678_v26 = vld [vmem:[%s2444_s17 + $0x18] sm:$0xf] }
  0x6d   : > { %1146 = vmatpush.bf16.msra.mxu1 %v1986_v34  ;;  %v1978_v19 = vld [vmem:[%s2444_s17 + $0x14] sm:$0xf]  ;;  %v2047_v23 = vld [vmem:[%s2765_s4 + $0x1f8] sm:$0xff]  ;;  %v1983_v27 = vld [vmem:[%s2444_s17 + $0x34] sm:$0xf0]  ;;  %v1667_v29 = vor.u32 %v1977_v21, %v1664_v22 }
  0x6e   : > { %566 = vmatpush.bf16.msra.mxu0 %v1969_v35  ;;  %v1672_v20 = vld [vmem:[%s2444_s17 + $0x30] sm:$0xf0]  ;;  %v1670_v30 = vld [vmem:[%s2444_s17 + $0x10] sm:$0xf]  ;;  %v2046_v32 = vld [vmem:[%s2765_s4 + $0x1f0] sm:$0xff]  ;;  %v1679_v33 = vor.u32 %v1983_v27, %v1678_v26 }
  0x6f   : > { %1161 = vmatpush.bf16.msra.mxu2 %v1993_v36  ;;  %v2032_v24 = vld [vmem:[%s2765_s4 + $0x180] sm:$0xff]  ;;  %v1675_v28 = vor.u32 %v1978_v19, %v1672_v20  ;;  %v2045_v35 = vld [vmem:[%s2765_s4 + $0x1e8] sm:$0xff] }
  0x70   : > { %1175 = vmatpush.bf16.msra.mxu3 %v2001_v37  ;;  %v2016_v25 = vld [vmem:[%s2765_s4 + $0x100] sm:$0xff]  ;;  %v2043_v37 = vld [vmem:[%s2765_s4 + $0x1d8] sm:$0xff] }
  0x71   : > { %1147 = vmatpush.bf16.msra.mxu1 %v1985_v38  ;;  %v1982_v31 = vld [vmem:[%s2444_s17 + $0x2c] sm:$0xf0]  ;;  %v2042_v38 = vld [vmem:[%s2765_s4 + $0x1d0] sm:$0xff] }
  0x72   : > { %567 = vmatpush.bf16.msra.mxu0 %v1968_v39  ;;  %v1671_v34 = vor.u32 %v1982_v31, %v1670_v30  ;;  %v2044_v36 = vld [vmem:[%s2765_s4 + $0x1e0] sm:$0xff]  ;;  %v2041_v39 = vld [vmem:[%s2765_s4 + $0x1c8] sm:$0xff] }
  0x73   : > { %1162 = vmatpush.bf16.msra.mxu2 %v1992_v40  ;;  %v2040_v40 = vld [vmem:[%s2765_s4 + $0x1c0] sm:$0xff] }
  0x74   : > { %1176 = vmatpush.bf16.msra.mxu3 %v2000_v43 }
  0x75   : > { %1148 = vmatpush.bf16.msra.mxu1 %v1984_v47  ;;  %568 = vmatmul.bf16.vlgmr.msra.gmra.mxu0 %v1967_v54  ;;  %v487_v47 = vld [vmem:[#allocation2 + $0x8] sm:$0xff] }
  0x76   : > { %1183 = vmatpush.bf16.msrb.mxu0 %v2015_v41  ;;  %1163 = vmatmul.bf16.vlgmr.msra.gmra.mxu2 %v1659_v53  ;;  %v1979_v41 = vld [vmem:[%s2444_s17 + $0x1c] sm:$0xf] }
  0x77   : > { %1211 = vmatpush.bf16.msrb.mxu2 %v2031_v42  ;;  %1177 = vmatmul.bf16.vlgmr.msra.gmra.mxu3 %v1663_v57  ;;  %v1680_v42 = vld [vmem:[%s2444_s17 + $0x38] sm:$0xf0] }
  0x78   : > { %1225 = vmatpush.bf16.msrb.mxu3 %v2039_v44  ;;  %1149 = vmatmul.bf16.vlgmr.msra.gmra.mxu1 %v1655_v58  ;;  %v1683_v43 = vor.u32 %v1979_v41, %v1680_v42  ;;  %v486_v44 = vld [vmem:[#allocation2] sm:$0xff] }
  0x79   : > { %1197 = vmatpush.bf16.msrb.mxu1 %v2023_v48 }
  0x7a   : > { %1184 = vmatpush.bf16.msrb.mxu0 %v2014_v55 }
  0x7b   : > { %1212 = vmatpush.bf16.msrb.mxu2 %v2030_v56 }
  0x7c   : > { %1226 = vmatpush.bf16.msrb.mxu3 %v2038_v59 }
  0x7d   : > { %1198 = vmatpush.bf16.msrb.mxu1 %v2022_v60 }
  0x7e   : > { %1185 = vmatpush.bf16.msrb.mxu0 %v2013_v61 }
  0x7f   : > { %1213 = vmatpush.bf16.msrb.mxu2 %v2029_v62 }
  0x80   : > { %1227 = vmatpush.bf16.msrb.mxu3 %v2037_v63 }
  0x81   : > { %1199 = vmatpush.bf16.msrb.mxu1 %v2021_v0 }
  0x82   : > { %1186 = vmatpush.bf16.msrb.mxu0 %v2012_v1 }
  0x83   : > { %1214 = vmatpush.bf16.msrb.mxu2 %v2028_v2 }
  0x84   : > { %1228 = vmatpush.bf16.msrb.mxu3 %v2036_v3 }
  0x85   : > { %1200 = vmatpush.bf16.msrb.mxu1 %v2020_v4 }
  0x86   : > { %1187 = vmatpush.bf16.msrb.mxu0 %v2011_v5 }
  0x87   : > { %1215 = vmatpush.bf16.msrb.mxu2 %v2027_v6 }
  0x88   : > { %1229 = vmatpush.bf16.msrb.mxu3 %v2035_v7 }
  0x89   : > { %1201 = vmatpush.bf16.msrb.mxu1 %v2019_v8 }
  0x8a   : > { %1188 = vmatpush.bf16.msrb.mxu0 %v2010_v9  ;;  %v579_v9 = vld [vmem:[#allocation3] sm:$0xff] }
  0x8b   : > { %1216 = vmatpush.bf16.msrb.mxu2 %v2026_v10 }
  0x8c   : > { %1230 = vmatpush.bf16.msrb.mxu3 %v2034_v11 }
  0x8d   : > { %1202 = vmatpush.bf16.msrb.mxu1 %v2018_v12 }
  0x8e   : > { %1189 = vmatpush.bf16.msrb.mxu0 %v2009_v13 }
  0x8f   : > { %1217 = vmatpush.bf16.msrb.mxu2 %v2025_v14 }
  0x90   : > { %1231 = vmatpush.bf16.msrb.mxu3 %v2033_v15 }
  0x91   : > { %1203 = vmatpush.bf16.msrb.mxu1 %v2017_v16  ;;  %v580_v16 = vld [vmem:[#allocation3 + $0x8] sm:$0xff] }
  0x92   : > { %1190 = vmatpush.bf16.msrb.mxu0 %v2008_v17 }
  0x93   : > { %1218 = vmatpush.bf16.msrb.mxu2 %v2024_v18 }
  0x94   : > { %1232 = vmatpush.bf16.msrb.mxu3 %v2032_v24 }
  0x95   : > { %1204 = vmatpush.bf16.msrb.mxu1 %v2016_v25  ;;  %1191 = vmatmul.bf16.vlgmr.msrb.gmra.mxu0 %v1667_v29 }
  0x96   : > { %1239 = vmatpush.bf16.msra.mxu0 %v2047_v23  ;;  %1219 = vmatmul.bf16.vlgmr.msrb.gmra.mxu2 %v1675_v28 }
  0x97   : > { %1233 = vmatmul.bf16.vlgmr.msrb.gmra.mxu3 %v1679_v33 }
  0x98   : > { %1205 = vmatmul.bf16.vlgmr.msrb.gmra.mxu1 %v1671_v34 }
  0x9a   : > { %1240 = vmatpush.bf16.msra.mxu0 %v2046_v32 }
  0x9e   : > { %1241 = vmatpush.bf16.msra.mxu0 %v2045_v35 }
  0xa2   : > { %1242 = vmatpush.bf16.msra.mxu0 %v2044_v36 }
  0xa6   : > { %1243 = vmatpush.bf16.msra.mxu0 %v2043_v37 }
  0xaa   : > { %1244 = vmatpush.bf16.msra.mxu0 %v2042_v38 }
  0xae   : > { %1245 = vmatpush.bf16.msra.mxu0 %v2041_v39 }
  0xb2   : > { %1246 = vmatpush.bf16.msra.mxu0 %v2040_v40 }
  0xb5   : > { %1247 = vmatmul.bf16.vlgmr.msra.gmra.mxu0 %v1683_v43 }
  0xf2   : > { %v569_v45 = vpop.f32.mrf.mxu0 }
  0xf3   : > { %v574_v46 = vadd.f32 %v569_v45, %v486_v44 }
  0xf5   : > { %577 = vst.msk [vmem:[#allocation2] sm:$0xff] %vm576_vm2, %v574_v46  ;;  %v1150_v50 = vpop.f32.mrf.mxu1 }
  0xf9   : > { %v1164_v51 = vpop.f32.mrf.mxu2 }
  0xfa   : > { %v571_v48 = vpop.f32.mrf.mxu0  ;;  %v1178_v52 = vpop.f32.mrf.mxu3  ;;  %v1165_v54 = vadd.f32 %v1164_v51, %v1150_v50 }
  0xfb   : > { %v575_v49 = vadd.f32 %v571_v48, %v487_v47 }
  0xfc   : > { %v1179_v57 = vadd.f32 %v1178_v52, %v1165_v54 }
  0xfd   : > { %578 = vst.msk [vmem:[#allocation2 + $0x8] sm:$0xff] %vm576_vm2, %v575_v49  ;;  %v1152_v53 = vpop.f32.mrf.mxu1 }
 0x101   : > { %v1166_v55 = vpop.f32.mrf.mxu2 }
 0x102   : > { %v1180_v58 = vpop.f32.mrf.mxu3  ;;  %v1167_v60 = vadd.f32 %v1166_v55, %v1152_v53 }
 0x104   : > { %v1181_v63 = vadd.f32 %v1180_v58, %v1167_v60 }
 0x112   : > { %v1192_v56 = vpop.f32.mrf.mxu0 }
 0x113   : > { %v1193_v61 = vadd.f32 %v1192_v56, %v1179_v57 }
 0x115   : > { %v1206_v59 = vpop.f32.mrf.mxu1 }
 0x116   : > { %v1207_v0 = vadd.f32 %v1206_v59, %v1193_v61 }
 0x119   : > { %v1220_v62 = vpop.f32.mrf.mxu2 }
 0x11a   : > { %v1194_v1 = vpop.f32.mrf.mxu0  ;;  %v1234_v2 = vpop.f32.mrf.mxu3  ;;  %v1221_v3 = vadd.f32 %v1220_v62, %v1207_v0 }
 0x11b   : > { %v1195_v4 = vadd.f32 %v1194_v1, %v1181_v63 }
 0x11c   : > { %v1235_v6 = vadd.f32 %v1234_v2, %v1221_v3 }
 0x11d   : > { %v1208_v5 = vpop.f32.mrf.mxu1 }
 0x11e   : > { %v1209_v7 = vadd.f32 %v1208_v5, %v1195_v4 }
 0x121   : > { %v1222_v8 = vpop.f32.mrf.mxu2 }
 0x122   : > { %v1223_v12 = vadd.f32 %v1222_v8, %v1209_v7  ;;  %v1236_v14 = vpop.f32.mrf.mxu3 }
 0x124   : > { %v1237_v15 = vadd.f32 %v1236_v14, %v1223_v12 }
 0x132   : > { %v1248_v10 = vpop.f32.mrf.mxu0 }
 0x133   : > { %v1249_v11 = vadd.f32 %v1248_v10, %v1235_v6 }
 0x135   : > { %v1253_v13 = vadd.f32 %v1249_v11, %v579_v9 }
 0x137   : > { %1256 = vst.msk [vmem:[#allocation3] sm:$0xff] %vm1255_vm3, %v1253_v13 }
 0x13a   : > { %v1250_v17 = vpop.f32.mrf.mxu0 }
 0x13b   : > { %v1251_v18 = vadd.f32 %v1250_v17, %v1237_v15  ;;  %1261 = sbr.rel (%p1940_p6) target bundleno = 750 (0x2ee), region = 124 }
 0x13d   : > { %v1254_v19 = vadd.f32 %v1251_v18, %v580_v16 }
 0x13f   : > { %1257 = vst.msk [vmem:[#allocation3 + $0x8] sm:$0xff] %vm1255_vm3, %v1254_v19 }
 0x140   : > { %v2672_v20 = vld [vmem:[#allocation2] sm:$0xff]  ;;  %v2674_v21 = vld [vmem:[#allocation2 + $0x8] sm:$0xff]  ;;  %v2267_v22 = vmov 32   ;;  %v1324_v45 = vld [vmem:[%s2767_s6 + $0x10] sm:$0x1]  ;;  %vm1343_vm14 = vcmask 1040384  }
 0x141   : > { %2145 = vset.pattern.permute.xlu0 %v2267_v22  ;;  %2146 = vrcp.f32 %v2672_v20  ;;  %v1277_v26 = vand.u32 2147483648, %v2672_v20  ;;  %vm1271_vm4 = vweird.f32 %v2672_v20  ;;  %v1275_v29 = vand.u32 2147483647, %v2672_v20  ;;  %v2049_v51 = vld [vmem:[%s2766_s5] sm:$0xff]  ;;  %v2051_v52 = vld [vmem:[%s2767_s6 + $0x8] sm:$0xff]  ;;  %v1311_v58 = vld [vmem:[#allocation3] sm:$0xff] }
 0x142   : > { %2148 = vrcp.f32 %v2674_v21  ;;  %vm1286_vm6 = vweird.f32 %v2674_v21  ;;  %v1292_v34 = vand.u32 2147483648, %v2674_v21  ;;  %v1290_v36 = vand.u32 2147483647, %v2674_v21  ;;  %1385 = vmatpush.bf16.msra.mxu1 %v2049_v51  ;;  %v2048_v53 = vld [vmem:[%s2441_s0] sm:$0xff] }
 0x143   : > { %v1278_v32 = vor.u32 1.1754944e-38, %v1277_v26  ;;  %vm1276_vm9 = vcmp.eq.f32.partialorder %v1275_v29, 8.507059e+37  ;;  %vm1264_vm10 = vcmp.gt.f32.partialorder %v2672_v20, 0.0  ;;  %vm1265_vm13 = vcmp.gt.f32.partialorder %v2674_v21, 0.0  ;;  %v2050_v54 = vld [vmem:[%s2767_s6] sm:$0xff] }
 0x144   : > { %v1293_v40 = vor.u32 1.1754944e-38, %v1292_v34  ;;  %vm1291_vm12 = vcmp.eq.f32.partialorder %v1290_v36, 8.507059e+37  ;;  %v1334_v46 = vunpack.c.l.b16 %v1324_v45  ;;  %v2268_v48 = vmov 0   ;;  %v1392_v55 = vld [vmem:[%s2768_s7] sm:$0xf] }
 0x145   : > { %v1345_v49 = vsel %vm1343_vm14, 65535, %v2268_v48  ;;  %vm1374_vm15 = vcmask 130048   ;;  %vm1396_vm0 = vcmask 1043456  }
 0x146   : > { %v1337_v47 = vpack.c.b16 %v1334_v46, %v1334_v46  ;;  %1958 = vmatmul.msk.bf16.vlgmr.msra.gmra.mxu1 %vm1374_vm15, %v2048_v53  ;;  %v1398_v56 = vsel %vm1396_vm0, %v1392_v55, 0  ;;  %v1312_v59 = vld [vmem:[#allocation3 + $0x8] sm:$0xff] }
 0x147   : > { %v2147_v23 = vpop.eup %2146  ;;  %1407 = vmatpush.bf16.msra.mxu2 %v1398_v56 }
 0x148   : > { %v2149_v24 = vpop.eup %2148  ;;  %v1267_v25 = vmul.f32 %v2147_v23, %v2672_v20  ;;  %vm1272_vm5 = vweird.f32 %v2147_v23  ;;  %v1347_v50 = vand.u32 %v1345_v49, %v1337_v47 }
 0x149   : > { %v1282_v27 = vmul.f32 %v2149_v24, %v2674_v21  ;;  %vm1287_vm7 = vweird.f32 %v2149_v24  ;;  %vm1273_vm8 = vmor %vm1271_vm4, %vm1272_vm5 }
 0x14a   : > { %v1268_v28 = vsub.f32 1.0, %v1267_v25  ;;  %vm1288_vm11 = vmor %vm1286_vm6, %vm1287_vm7  ;;  %1354 = vmatpush.bf16.msra.mxu0 %v1347_v50 }
 0x14b   : > { %v1283_v30 = vsub.f32 1.0, %v1282_v27 }
 0x14c   : > { %v1269_v31 = vmul.f32 %v2147_v23, %v1268_v28 }
 0x14d   : > { %v1284_v33 = vmul.f32 %v2149_v24, %v1283_v30 }
 0x14e   : > { %v1270_v35 = vadd.f32 %v2147_v23, %v1269_v31  ;;  %1355 = vmatpush.bf16.msra.mxu0 %v2051_v52 }
 0x14f   : > { %v1285_v37 = vadd.f32 %v2149_v24, %v1284_v33 }
 0x150   : > { %v1274_v38 = vsel %vm1273_vm8, %v2147_v23, %v1270_v35 }
 0x151   : > { %v1279_v39 = vsel %vm1276_vm9, %v1278_v32, %v1274_v38  ;;  %v1289_v42 = vsel %vm1288_vm11, %v2149_v24, %v1285_v37 }
 0x152   : > { %v1296_v41 = vsel %vm1264_vm10, %v1279_v39, 0.0  ;;  %v1294_v43 = vsel %vm1291_vm12, %v1293_v40, %v1289_v42  ;;  %1356 = vmatpush.bf16.msra.mxu0 %v2050_v54 }
 0x153   : > { %1300 = vperm.xlu0 %2145, %v1296_v41   ;;  %v1297_v44 = vsel %vm1265_vm13, %v1294_v43, 0.0 }
 0x15b   : > { %1305 = vperm.xlu0 %2145, %v1297_v44  }
 0x1c3   : > { %v1387_v4 = vpop.f32.mrf.mxu1 }
 0x1c5   : > { %v1301_v57 = vpop.permute.xlu0 %1300 }
 0x1c6   : > { %v1308_v61 = vmul.f32 %v1301_v57, %v2672_v20  ;;  %v1313_v62 = vmul.f32 %v1311_v58, %v1301_v57 }
 0x1cb   : > { %v1389_v11 = vpop.f32.mrf.mxu1 }
 0x1cd   : > { %v1306_v60 = vpop.permute.xlu0 %1305 }
 0x1ce   : > { %v1309_v63 = vmul.f32 %v1306_v60, %v2674_v21  ;;  %v1314_v0 = vmul.f32 %v1312_v59, %v1306_v60 }
 0x1d0   : > { %v1310_v1 = vpack.c.bf16 %v1309_v63, %v1308_v61  ;;  %v1315_v2 = vpack.c.bf16 %v1314_v0, %v1313_v62 }
 0x1d2   : > { %1949 = vmatmul.msk.bf16.vlgmr.msra.gmra.mxu0 %vm576_vm2, %v1310_v1  ;;  %1959 = vmatmul.msk.bf16.vlgmr.msra.gmra.mxu2 %vm1255_vm3, %v1315_v2 }
 0x24f   : > { %v1358_v3 = vpop.f32.mrf.mxu0 }
 0x250   : > { %v1388_v5 = vadd.f32 %v1387_v4, %v1358_v3 }
 0x255   : > { %v1409_v6 = vpop.f32.mrf.mxu2 }
 0x256   : > { %v1414_v7 = vadd.f32 %v1409_v6, %v1388_v5 }
 0x257   : > { %v1360_v9 = vpop.f32.mrf.mxu0 }
 0x258   : > { %v1416_v8 = vmax.f32 %v1414_v7, 0.0  ;;  %v1390_v12 = vadd.f32 %v1389_v11, %v1360_v9 }
 0x25a   : > { %v1418_v10 = vmul.f32 %v1416_v8, %v1416_v8 }
 0x25c   : > { %1420 = vadd.xlane.f32.xlu1 %v1418_v10 }
 0x25d   : > { %v1411_v13 = vpop.f32.mrf.mxu2 }
 0x25e   : > { %v1415_v14 = vadd.f32 %v1411_v13, %v1390_v12 }
 0x260   : > { %v1417_v15 = vmax.f32 %v1415_v14, 0.0 }
 0x262   : > { %v1419_v16 = vmul.f32 %v1417_v15, %v1417_v15 }
 0x264   : > { %1422 = vadd.xlane.f32.xlu1 %v1419_v16 }
 0x2cf   : > { %v1421_v17 = vpop.xlane.xlu1 %1420 }
 0x2d0   : > { %2150 = vrsqrt.f32 %v1421_v17  ;;  %vm1432_vm2 = vweird.f32 %v1421_v17  ;;  %vm1424_vm4 = vcmp.gt.f32.partialorder %v1421_v17, 0.0 }
 0x2d6   : > { %v2151_v18 = vpop.eup %2150 }
 0x2d7   : > { %v1427_v19 = vmul.f32 %v2151_v18, %v1421_v17  ;;  %v1423_v20 = vpop.xlane.xlu1 %1422  ;;  %vm1433_vm1 = vweird.f32 %v2151_v18 }
 0x2d8   : > { %2152 = vrsqrt.f32 %v1423_v20  ;;  %vm1434_vm3 = vmor %vm1432_vm2, %vm1433_vm1  ;;  %vm1442_vm6 = vweird.f32 %v1423_v20  ;;  %vm1425_vm8 = vcmp.gt.f32.partialorder %v1423_v20, 0.0 }
 0x2d9   : > { %v1428_v21 = vmul.f32 %v2151_v18, %v1427_v19 }
 0x2db   : > { %v1429_v22 = vmul.f32 0.5, %v1428_v21 }
 0x2dd   : > { %v1430_v23 = vsub.f32 1.5, %v1429_v22 }
 0x2de   : > { %v2153_v24 = vpop.eup %2152 }
 0x2df   : > { %v1431_v25 = vmul.f32 %v2151_v18, %v1430_v23  ;;  %v1437_v26 = vmul.f32 %v2153_v24, %v1423_v20  ;;  %vm1443_vm5 = vweird.f32 %v2153_v24 }
 0x2e0   : > { %vm1444_vm7 = vmor %vm1442_vm6, %vm1443_vm5 }
 0x2e1   : > { %v1435_v27 = vsel %vm1434_vm3, %v2151_v18, %v1431_v25  ;;  %v1438_v28 = vmul.f32 %v2153_v24, %v1437_v26 }
 0x2e2   : > { %v1446_v29 = vsel %vm1424_vm4, %v1435_v27, 1.0 }
 0x2e3   : > { %v1448_v30 = vmul.f32 %v1446_v29, %v1416_v8  ;;  %v1439_v31 = vmul.f32 0.5, %v1438_v28 }
 0x2e5   : > { %1450 = vst [vmem:[%s2446_s1] sm:$0xff] %v1448_v30  ;;  %v1440_v32 = vsub.f32 1.5, %v1439_v31 }
 0x2e7   : > { %v1441_v33 = vmul.f32 %v2153_v24, %v1440_v32 }
 0x2e9   : > { %v1445_v34 = vsel %vm1444_vm7, %v2153_v24, %v1441_v33 }
 0x2ea   : > { %v1447_v35 = vsel %vm1425_vm8, %v1445_v34, 1.0 }
 0x2eb   : > { %v1449_v36 = vmul.f32 %v1447_v35, %v1417_v15 }
 0x2ed   : > { %1451 = vst [vmem:[%s2446_s1 + $0x8] sm:$0xff] %v1449_v36 }
 0x2ee PF: > { %s2052_s0 = sshll.u32 %s2252_s11, 4  ;;  %s1465_s18 = sshll.u32 %s2446_s1, 4  ;;  %s1466_s18 = int_to_ptr.vmem [resolvable:$true] %s1465_s18 }
 0x2ef   : > { %s1464_s24 = scalar_lea.hbm %s2769_s8, %s2052_s0  ;;  %s2790_s10 = sand.u32 1, %s2232_s28  }
 0x2f0   : > { %s1467_s21 = sshll.u32 %s1464_s24, 4  ;;  %s1453_s17 = scalar_lea.sflag [#allocation7], %s2790_s10  ;;  %s1468_s21 = int_to_ptr.hbm [resolvable:$true] %s1467_s21 }
 0x2f1   : > { %s2168_s29 = sshra.s32 %s1468_s21, 4  ;;  %s2174_s11 = scalar_lea.hbm %s2769_s8, 32  ;;  %s2169_s29 = int_to_ptr.hbm [resolvable:$true] %s2168_s29 }
 0x2f2   : > { %s2170_s19 = scalar_lea.hbm %s2169_s29, 16  ;;  %p2175_p11 = scmp.lt.s32.totalorder %s2169_s29, %s2769_s8 }
 0x2f3   : > { %p2171_p8 = scmp.ne.s32.totalorder %s2169_s29, %s2170_s19  ;;  %p2176_p13 = scmp.lt.s32.totalorder %s2174_s11, %s2170_s19 }
 0x2f5   : > { %p2172_p9 = pnand %p2171_p8, %p2388_p7  ;;  %p2177_p0 = por %p2176_p13, %p2175_p11 }
 0x2f7   : > { %p2173_p10 = pneg %p2172_p9 }
 0x2f9   : > { %p2178_p1 = pnand %p2177_p0, %p2173_p10 }
 0x2fb   : > { %2181 = shalt.err (!%p2178_p1)
}
 0x2fc   : > { %s2269_s1 = smov 128   ;;  %s2270_s25 = smov 8  }
 0x2fd   : > { %2053 = dma.vmem_to_hbm [thread:$0]  (%p2388_p7), %s1466_s18, 256, %s1468_s21, %s1453_s17, %s2269_s1, %s2269_s1, %s2270_s25  }
 0x2fe PF: > { %s2791_s27 = sld [smem:[#allocation9_spill]]  ;;  %p2059_p2 = scmp.ge.s32.totalorder %s2264_s14, 2 }
 0x300   : > { %p2056_p3 = pnand %p2059_p2, %p2396_p12 }
 0x302   : > { %p2057_p4 = pneg %p2056_p3 }
 0x304   : > { %s1482_s30 = sand.u32 1, %s2791_s27  }
 0x305   : > { %s1483_s26 = scalar_lea.sflag [#allocation7], %s1482_s30 }
 0x306   : > { %2223 = dma.done.wait (%p2057_p4), %s1483_s26, 256  }
 0x307   : > { %2225 = vsyncadd (%p2057_p4), %s1483_s26, 4294967040  ;;  %s21_s14 = sadd.s32 1, %s2264_s14   ;;  %s2793_s24 = sld [smem:[#allocation10_spill]] }
 0x308   : > { %p18_p5 = scmp.ge.s32.totalorder %s21_s14, 6   ;;  %s2794_s29 = sld [smem:[#allocation14_spill]] }
 0x309   : > { %s2795_s23 = sld [smem:[#allocation15_spill]]  ;;  %s2798_s27 = smov %s2232_s28 }
 0x30a   : > { %s2796_s18 = sld [smem:[#allocation11_spill]]  ;;  %s2800_s30 = smov %s2244_s9 }
 0x30b   : > { %s2797_s21 = sld [smem:[#allocation12_spill]]  ;;  %s2802_s10 = smov %s2256_s12 }
 0x30c   : > { %s2803_s11 = smov %s2260_s13 }
 0x30d   : > { %s2799_s28 = smov %s2793_s24  ;;  %20 = sbr.rel (!%p18_p5) target bundleno = 9 (0x9), region = 178 }
 0x30f   : > { %s2801_s9 = smov %s2795_s23 }
 0x310   : > { %s2804_s12 = smov %s2796_s18 }
 0x311   : > { %s2805_s13 = smov %s2797_s21 }
 0x312   :  { %1489 = vsyncpa [#allocation7], 1 }
 0x313   :  { %1491 = vsyncpa [#allocation7 + $0x1], 1 }

</bundles_post_ra>
